<compile_context>
chip_gen: v7x
topology: tpu7x:2x2x1
jax: 0.10.0
libtpu: 0.0.40
codegen_flags: <defaults>
</compile_context>

<pallas_src>
import math

import jax
import jax.numpy as jnp
from jax.experimental import pallas as pl
from jax.experimental.pallas import tpu as pltpu

_LANE = 128


def _attention_gate_kernel(x_ref, w_ref, b_ref, o_ref):
    # x_ref: (C, TS)  one image's spatial tile; channels on sublanes, pixels on lanes.
    # w_ref: (C, 1)   fused per-channel weight (f32, VMEM, resident across the grid).
    # b_ref: (1,)     fused scalar bias (f32, SMEM).
    x = x_ref[...]
    xf = x.astype(jnp.float32)  # f32 for the channel reduction (cheap, exact-ish)

    # attention logit: per-channel scale (VPU) + cross-sublane reduce (XLU) -> (1, TS)
    logit = jnp.sum(xf * w_ref[...], axis=0, keepdims=True) + b_ref[0]
    att = jax.nn.sigmoid(logit)  # EUP

    # gate in the input dtype (halves vreg/VALU work for bf16 inputs on v6e/v7x;
    # identical result for f32 inputs); lane-dense store.
    o_ref[...] = x * att.astype(x.dtype)


def _chip_budgets():
    """Per-generation (4-buffer resident-set budget, scoped-VMEM cap) in bytes."""
    kind = ""
    try:
        kind = jax.devices()[0].device_kind.lower()
    except Exception:
        pass
    mib = 1024 * 1024
    if "v5" in kind:      # v5e: 16 MiB default scoped VMEM; stay lean
        return 10 * mib, 16 * mib
    if "v6" in kind:      # v6e: 128 MiB physical VMEM; plenty of headroom
        return 24 * mib, 48 * mib
    # v7x (64 MiB physical per TC) or unknown chip: stay comfortably under the limit
    return 20 * mib, 40 * mib


def attention_block(x_nchw, w1, b1, w2, b2, *, tile_s=None):
    """x_nchw: (N, C, H, W).  w1: (C, C), b1: (C,), w2: (1, C), b2: (1,)."""
    N, C, H, W = x_nchw.shape
    S = H * W

    # --- fuse conv1 (C->C) and conv2 (C->1): both linear, nothing in between.
    w1f = w1.astype(jnp.float32)
    w2f = w2.astype(jnp.float32)
    w_eff = jnp.matmul(w1f.T, w2f.T)                                  # (C, 1)
    b_eff = (jnp.matmul(b1.astype(jnp.float32), w2f.T)
             + b2.astype(jnp.float32)).reshape(1)                     # (1,)

    # --- NCHW viewed as (N, C, S): pure reshape, no data movement.
    x_flat = x_nchw.reshape(N, C, S)

    # --- spatial tile: biggest lane-dense tile whose double-buffered
    #     2-input + 2-output resident set fits the per-chip VMEM budget.
    itemsize = jnp.dtype(x_nchw.dtype).itemsize
    budget_bytes, vmem_cap = _chip_budgets()

    ts = max(_LANE, budget_bytes // (4 * C * itemsize))
    if tile_s is not None:
        ts = min(ts, max(_LANE, int(tile_s)))
    ts = max(_LANE, (ts // _LANE) * _LANE)

    if ts >= S:
        if N >= 2 or S <= _LANE:
            # one full-extent block per image: no masking, fewest grid steps.
            ts = S
        else:
            # N == 1: split the spatial axis so both TensorCores (v7x) get work.
            ts = pl.cdiv(pl.cdiv(S, 2), _LANE) * _LANE
    # else: ts is a multiple of 128; the ragged last block (if S % ts != 0) is
    # handled by Pallas masked stores -- no HBM pad/slice passes needed.

    grid = (N, pl.cdiv(S, ts))

    # scoped-VMEM limit sized to the actual resident set (+ headroom), per chip.
    resident = 4 * C * ts * itemsize + 2 * C * 4 + 1024
    vmem_limit = int(min(vmem_cap,
                         max(16 * 1024 * 1024, resident + 2 * 1024 * 1024)))

    out_flat = pl.pallas_call(
        _attention_gate_kernel,
        out_shape=jax.ShapeDtypeStruct((N, C, S), x_nchw.dtype),
        grid=grid,
        in_specs=[
            # x: one image (leading dim squeezed), full channel axis, lane-dense tile
            pl.BlockSpec((None, C, ts), lambda n, s: (n, 0, s)),
            # fused per-channel weight, constant block across the grid
            pl.BlockSpec((C, 1), lambda n, s: (0, 0)),
            # fused scalar bias lives in SMEM (no VMEM block / vector load)
            pl.BlockSpec(memory_space=pltpu.MemorySpace.SMEM),
        ],
        out_specs=pl.BlockSpec((None, C, ts), lambda n, s: (n, 0, s)),
        compiler_params=pltpu.CompilerParams(
            dimension_semantics=("parallel", "parallel"),
            vmem_limit_bytes=vmem_limit),
    )(x_flat, w_eff, b_eff)

    return out_flat.reshape(N, C, H, W)


def _reference(x_nchw, w1, b1, w2, b2):
    # plain-JAX reference matching the (unfused) PyTorch forward
    x = jnp.transpose(x_nchw, (0, 2, 3, 1))                     # NHWC
    a1 = jnp.einsum("nhwc,oc->nhwo", x, w1) + b1
    a2 = jnp.einsum("nhwc,oc->nhwo", a1, w2) + b2
    att = jax.nn.sigmoid(a2)
    out = x * att
    return jnp.transpose(out, (0, 3, 1, 2))                     # NCHW


def _init_params(key, in_channels):
    """Deterministic init mimicking nn.Conv2d defaults (kaiming uniform, 1x1 kernel)."""
    k1, k2, k3, k4 = jax.random.split(key, 4)
    bound1 = 1.0 / math.sqrt(in_channels)
    w1 = jax.random.uniform(k1, (in_channels, in_channels), jnp.float32,
                            -bound1, bound1)
    b1 = jax.random.uniform(k2, (in_channels,), jnp.float32, -bound1, bound1)

    bound2 = 1.0 / math.sqrt(in_channels)
    w2 = jax.random.uniform(k3, (1, in_channels), jnp.float32, -bound2, bound2)
    b2 = jax.random.uniform(k4, (1,), jnp.float32, -bound2, bound2)
    return w1, b1, w2, b2


if __name__ == "__main__":
    key = jax.random.PRNGKey(0)
    kx, kp = jax.random.split(key)

    N, C, H, W = 2, 4, 16, 16
    x = jax.random.normal(kx, (N, C, H, W), dtype=jnp.float32)
    w1, b1, w2, b2 = _init_params(kp, C)

    out = attention_block(x, w1, b1, w2, b2)
    out = jax.block_until_ready(out)

    ref = _reference(x, w1, b1, w2, b2)
    assert out.shape == (N, C, H, W)
    assert out.dtype == x.dtype
    # fused conv1+conv2 reorders FP ops vs the unfused reference -> tiny rounding diff
    assert jnp.allclose(out, ref, atol=1e-5, rtol=1e-5), "mismatch vs reference"

    print("KERNEL_OK")
</pallas_src>

<mosaic_0001>
module attributes {stable_mosaic.version = 11 : i64} {
  func.func @_attention_gate_kernel(%arg0: i32, %arg1: i32, %arg2: memref<1x4x256xf32, #tpu.memory_space<vmem>>, %arg3: memref<4x1xf32, #tpu.memory_space<vmem>>, %arg4: memref<1xf32, #tpu.memory_space<smem>>, %arg5: memref<1x4x256xf32, #tpu.memory_space<vmem>>) attributes {dimension_semantics = [#tpu.dimension_semantics<parallel>, #tpu.dimension_semantics<parallel>], iteration_bounds = array<i64: 2, 1>, scalar_prefetch = 0 : i64, scratch_operands = 0 : i64, tpu.core_type = #tpu.core_type<tc>, window_params = [{transform_indices = @transform_0, window_bounds = array<i64: 1, 4, 256>}, {pipeline_mode = #tpu.pipeline_mode<synchronous>, transform_indices = @transform_1, window_bounds = array<i64: 4, 1>}, {transform_indices = @transform_2, window_bounds = array<i64: 1>}, {transform_indices = @transform_3, window_bounds = array<i64: 1, 4, 256>}]} {
    %c0 = arith.constant 0 : index
    %c0_0 = arith.constant 0 : index
    %c0_1 = arith.constant 0 : index
    %0 = vector.load %arg2[%c0, %c0_0, %c0_1] : memref<1x4x256xf32, #tpu.memory_space<vmem>>, vector<1x4x256xf32>
    %1 = vector.shape_cast %0 : vector<1x4x256xf32> to vector<4x256xf32>
    %c0_2 = arith.constant 0 : index
    %c0_3 = arith.constant 0 : index
    %2 = vector.load %arg3[%c0_2, %c0_3] : memref<4x1xf32, #tpu.memory_space<vmem>>, vector<4x1xf32>
    %3 = vector.broadcast %2 : vector<4x1xf32> to vector<4x256xf32>
    %4 = arith.mulf %1, %3 : vector<4x256xf32>
    %cst = arith.constant dense<0.000000e+00> : vector<256xf32>
    %5 = vector.multi_reduction <add>, %4, %cst [0] : vector<4x256xf32> to vector<256xf32>
    %6 = vector.shape_cast %5 : vector<256xf32> to vector<1x256xf32>
    %c0_4 = arith.constant 0 : index
    %7 = memref.load %arg4[%c0_4] : memref<1xf32, #tpu.memory_space<smem>>
    %8 = vector.broadcast %7 : f32 to vector<1x256xf32>
    %9 = arith.addf %6, %8 : vector<1x256xf32>
    %10 = arith.negf %9 : vector<1x256xf32>
    %11 = math.exp %10 : vector<1x256xf32>
    %cst_5 = arith.constant 1.000000e+00 : f32
    %12 = vector.broadcast %cst_5 : f32 to vector<1x256xf32>
    %13 = arith.addf %12, %11 : vector<1x256xf32>
    %14 = arith.divf %12, %13 : vector<1x256xf32>
    %15 = vector.broadcast %14 : vector<1x256xf32> to vector<4x256xf32>
    %16 = arith.mulf %1, %15 : vector<4x256xf32>
    %c0_6 = arith.constant 0 : index
    %c0_7 = arith.constant 0 : index
    %c0_8 = arith.constant 0 : index
    %17 = vector.load %arg5[%c0_6, %c0_7, %c0_8] : memref<1x4x256xf32, #tpu.memory_space<vmem>>, vector<1x4x256xf32>
    %18 = vector.shape_cast %17 : vector<1x4x256xf32> to vector<4x256xf32>
    %19 = vector.shape_cast %16 : vector<4x256xf32> to vector<1x4x256xf32>
    tpu.vector_store %arg5[%c0_6, %c0_7, %c0_8], %19 {strides = array<i32>} : memref<1x4x256xf32, #tpu.memory_space<vmem>>, vector<1x4x256xf32>,
    return
  }
  func.func @transform_0(%arg0: i32, %arg1: i32) -> (i32, i32, i32) {
    %c0_i32 = arith.constant 0 : i32
    %c0_i32_0 = arith.constant 0 : i32
    return %arg0, %c0_i32, %arg1 : i32, i32, i32
  }
  func.func @transform_1(%arg0: i32, %arg1: i32) -> (i32, i32) {
    %c0_i32 = arith.constant 0 : i32
    %c0_i32_0 = arith.constant 0 : i32
    %c0_i32_1 = arith.constant 0 : i32
    return %c0_i32, %c0_i32_0 : i32, i32
  }
  func.func @transform_2(%arg0: i32, %arg1: i32) -> i32 {
    %c0_i32 = arith.constant 0 : i32
    %c0_i32_0 = arith.constant 0 : i32
    return %c0_i32 : i32
  }
  func.func @transform_3(%arg0: i32, %arg1: i32) -> (i32, i32, i32) {
    %c0_i32 = arith.constant 0 : i32
    %c0_i32_0 = arith.constant 0 : i32
    return %arg0, %c0_i32, %arg1 : i32, i32, i32
  }
}

</mosaic_0001>

<bundles_post_ra>
// kernel: tpu_custom_call.1
= control target key start
LH: loop header
LB: loop body
LE: loop exit
PB: predicated region body
PF: predicated region fallthrough
CT: control target
= control target key end

     0   :  { %s776_s0 = inlined_call_operand.hbm [shape: f32[2,4,256], index: 0, kind: input, shape index: {}]   ;;  %s777_s1 = inlined_call_operand.vmem [shape: f32[4,1], index: 1, kind: input, shape index: {}]   ;;  %s778_s2 = inlined_call_operand.<no memory space> [shape: f32[1], index: 2, kind: input, shape index: {}]   ;;  %s779_s3 = inlined_call_operand.hbm [shape: f32[2,4,256], index: 3, kind: output, shape index: {}]  }
   0x1   :  { %8 = sst [smem:[#allocation2]] %s778_s2 }
   0x2   :  { %9 = vsyncpa [#allocation4], 0 }
   0x3   :  { %11 = vsyncpa [#allocation4 + $0x1], 0 }
   0x4   :  { %12 = vsyncpa [#allocation5], 0 }
   0x5   :  { %14 = vsyncpa [#allocation5 + $0x1], 0  ;;  %s597_s14 = smov 0   ;;  %s599_s15 = smov 0  }
   0x6   :  { %s601_s16 = smov 0   ;;  %s603_s17 = smov 0  }
   0x7   :  { %s605_s18 = smov 0   ;;  %s607_s19 = smov 0  }
   0x8 LB: > { %s364_s2 = sadd.s32 4294967295, %s568_s19   ;;  %s365_s20 = sadd.s32 4294967294, %s568_s19   ;;  %s568_s19 = sphi %s607_s19, %s20_s19   ;;  %s564_s18 = sphi %s605_s18, %s795_s18   ;;  %s560_s17 = sphi %s603_s17, %s794_s17   ;;  %s556_s16 = sphi %s601_s16, %s793_s16   ;;  %s552_s15 = sphi %s599_s15, %s792_s15   ;;  %s548_s14 = sphi %s597_s14, %s791_s14  }
   0x9   : > { %s32_s21 = sadd.s32 1, %s564_s18  ;;  %s41_s22 = sadd.s32 1, %s556_s16 }
   0xa   : > { %p34_p0 = scmp.ge.s32.totalorder %s32_s21, 2  ;;  %p48_p1 = scmp.ne.s32.totalorder %s556_s16, %s552_s15 }
   0xb   : > { %p49_p2 = scmp.eq.s32.totalorder %s568_s19, 0  ;;  %p54_p3 = scmp.ne.s32.totalorder %s552_s15, %s548_s14 }
   0xc   : > { %s797_s21 = smov (%p34_p0, %s32_s21), 0  ;;  %p55_p5 = scmp.eq.s32.totalorder %s364_s2, 0 }
   0xd   : > { %p638_p4 = por %p49_p2, %p48_p1  ;;  %s36_s24 = ssub.s32 %s564_s18, %s797_s21 }
   0xe   : > { %p122_p6 = scmp.eq.s32.totalorder %s364_s2, 1  ;;  %p39_p7 = scmp.eq.s32.totalorder %s36_s24, 0 }
   0xf   : > { %p644_p8 = por %p55_p5, %p54_p3  ;;  %p128_p10 = scmp.eq.s32.totalorder %s365_s20, 1 }
  0x10   : > { %p648_p9 = por %p122_p6, %p48_p1  ;;  %p395_p13 = scmp.lt.s32.totalorder %s568_s19, 2 }
  0x11   : > { %s653_s27 = scalar_select %p39_p7, %s556_s16, %s41_s22  }
  0x12   : > { %s783_s26 = scalar_select %p648_p9, 1, 0 }
  0x13   : > { %p655_p11 = por %p128_p10, %p54_p3  ;;  %s154_s29 = sand.u32 1, %s556_s16  }
  0x14   : > { %s368_s30 = sshll.u32 %s154_s29, 3  ;;  %s381_s4 = sshll.u32 %s564_s18, 7 }
  0x15   : > { %s784_s28 = scalar_select %p655_p11, 1, 0 }
  0x16   : > { %s666_s7 = scalar_lea.hbm %s776_s0, %s381_s4  ;;  %s158_s8 = scalar_lea.vmem [#allocation3], %s368_s30 }
  0x17   : > { %s168_s9 = sshll.u32 %s158_s8, 4  ;;  %p672_p0 = pnand %p395_p13, %p638_p4  ;;  %s668_s9 = int_to_ptr.vmem [resolvable:$true] %s168_s9 }
  0x18   : > { %s155_s11 = scalar_lea.sflag [#allocation4], %s154_s29  ;;  %s456_s12 = scalar_lea.hbm %s666_s7, 128 }
  0x19   : > { %p457_p3 = scmp.ne.s32.totalorder %s666_s7, %s456_s12  ;;  %p458_p5 = pneg %p672_p0 }
  0x1a   : > { %s461_s20 = scalar_lea.hbm %s776_s0, 256  ;;  %p462_p4 = scmp.lt.u32.totalorder %s666_s7, %s776_s0 }
  0x1b   : > { %p459_p6 = pnand %p458_p5, %p457_p3  ;;  %p463_p10 = scmp.lt.u32.totalorder %s461_s20, %s456_s12 }
  0x1c   : > { %p465_p12 = scmp.lt.u32.totalorder %s456_s12, %s666_s7 }
  0x1d   : > { %p460_p7 = pneg %p459_p6  ;;  %p464_p13 = por %p463_p10, %p462_p4 }
  0x1f   : > { %p466_p1 = por %p465_p12, %p464_p13 }
  0x21   : > { %p467_p2 = pnand %p466_p1, %p460_p7 }
  0x23   : > { %470 = shalt.err (!%p467_p2)
}
  0x24   : > { %s471_s24 = scalar_lea.vmem %s668_s9, 128  ;;  %s570_s29 = smov [#allocation3]  }
  0x25   : > { %p472_p3 = scmp.ne.s32.totalorder %s668_s9, %s471_s24  ;;  %s476_s30 = sshll.u32 %s570_s29, 4  ;;  %s477_s30 = int_to_ptr.vmem [resolvable:$false] %s476_s30 }
  0x26   : > { %s478_s4 = scalar_lea.vmem %s477_s30, 256  ;;  %p479_p9 = scmp.lt.s32.totalorder %s668_s9, %s477_s30 }
  0x27   : > { %p474_p6 = pnand %p472_p3, %p458_p5  ;;  %p480_p4 = scmp.lt.s32.totalorder %s478_s4, %s471_s24 }
  0x29   : > { %p475_p11 = pneg %p474_p6  ;;  %p481_p10 = por %p480_p4, %p479_p9 }
  0x2b   : > { %p482_p12 = pnand %p481_p10, %p475_p11 }
  0x2d   : > { %485 = shalt.err (!%p482_p12)
}
  0x2e   : > { %390 = dma.hbm_to_vmem [thread:$0]  (!%p672_p0), %s666_s7, 128, %s668_s9, %s155_s11  }
  0x2f   : > { %p786_p1 = scmp.lt.s32.totalorder %s568_s19, 3  ;;  %p787_p2 = scmp.ge.s32.totalorder %s568_s19, 1 }
  0x31   : > { %p174_p5 = pnand %p787_p2, %p786_p1 }
  0x32   : > { %s708_s5 = sand.u32 (!%p174_p5), 1, %s552_s15  }
  0x33   : > { %177 = sbr.rel (%p174_p5) target bundleno = 254 (0xfe), region = 32  ;;  %s372_s6 = sshll.u32 (!%p174_p5), %s708_s5, 3 }
  0x34   : > { %s180_s8 = scalar_lea.sflag (!%p174_p5), [#allocation4], %s708_s5  ;;  %s183_s10 = scalar_lea.vmem (!%p174_p5), [#allocation3], %s372_s6 }
  0x3a   : > { %539 = dma.done.wait (%p644_p8), %s180_s8, 128  }
  0x3b   : > { %541 = vsyncadd (%p644_p8), %s180_s8, 4294967168  ;;  %v571_v0 = vmov 0   ;;  %v209_v1 = vld [vmem:[%s777_s1] sm:$0xf]  ;;  %v572_v2 = vmov 839922192   ;;  %v217_v4 = vlaneseq }
  0x3c   : > { %447 = vset.pattern.permute.xlu0 %v571_v0  ;;  %v215_v3 = vunpack.c.l.s4 %v572_v2  ;;  %v208_v9 = vld [vmem:[%s183_s10] sm:$0xff]  ;;  %vm226_vm0 = vcmask 1043456   ;;  %s241_s25 = sld [smem:[#allocation2]]  ;;  %s382_s11 = sshll.u32 %s560_s17, 7 }
  0x3d   : > { %212 = vperm.xlu0 %447, %v209_v1   ;;  %v218_v6 = vshrl.u32 %v217_v4, 7  ;;  %s205_s12 = scalar_lea.vmem [#allocation6], %s372_s6  ;;  %s727_s22 = scalar_lea.hbm %s779_s3, %s382_s11 }
  0x3e   : > { %v216_v5 = vunpack.c.0.s8 %v215_v3  ;;  %s280_s13 = sshll.u32 %s205_s12, 4  ;;  %s264_s23 = scalar_lea.sflag [#allocation5], %s708_s5  ;;  %s729_s13 = int_to_ptr.vmem [resolvable:$true] %s280_s13 }
  0x3f   : > { %s486_s24 = scalar_lea.vmem %s729_s13, 128  ;;  %p788_p9 = scmp.ne.s32.totalorder %s783_s26, 0 }
  0x40   : > { %v219_v7 = vsub.s32 %v216_v5, %v218_v6  ;;  %p487_p8 = scmp.ne.s32.totalorder %s729_s13, %s486_s24  ;;  %s573_s17 = smov [#allocation6]  }
  0x41   : > { %s490_s29 = sshll.u32 %s573_s17, 4  ;;  %s491_s29 = int_to_ptr.vmem [resolvable:$false] %s490_s29 }
  0x42   : > { %v242_v24 = vstv %s241_s25  ;;  %p488_p11 = pnand %p487_p8, %p788_p9  ;;  %s492_s30 = scalar_lea.vmem %s491_s29, 256 }
  0x43   : > { %p493_p7 = scmp.lt.s32.totalorder %s729_s13, %s491_s29  ;;  %p494_p13 = scmp.lt.s32.totalorder %s492_s30, %s486_s24 }
  0x44   : > { %p489_p0 = pneg %p488_p11 }
  0x45   : > { %p495_p3 = por %p494_p13, %p493_p7 }
  0x47   : > { %p496_p6 = pnand %p495_p3, %p489_p0 }
  0xbc   : > { %v213_v8 = vpop.permute.xlu0 %212 }
  0xbd   : > { %v220_v10 = vrot.slane %v213_v8, %v219_v7 }
  0xbf   : > { %v222_v11 = vmul.f32 %v220_v10, %v208_v9 }
  0xc1   : > { %v224_v12 = vcombine.high %v222_v11, %v222_v11  ;;  %v227_v13 = vsel %vm226_vm0, %v222_v11, 0.0 }
  0xc2   : > { %v228_v14 = vrot.slane %v227_v13, 4 }
  0xc3   : > { %v234_v15 = vsel %vm226_vm0, %v224_v12, 0.0 }
  0xc4   : > { %v229_v16 = vadd.f32 %v228_v14, %v227_v13  ;;  %v235_v17 = vrot.slane %v234_v15, 4 }
  0xc6   : > { %v230_v18 = vrot.slane %v229_v16, 2  ;;  %v236_v19 = vadd.f32 %v235_v17, %v234_v15 }
  0xc8   : > { %v231_v20 = vadd.f32 %v230_v18, %v229_v16  ;;  %v237_v21 = vrot.slane %v236_v19, 2 }
  0xca   : > { %v232_v22 = vrot.slane %v231_v20, 1  ;;  %v238_v23 = vadd.f32 %v237_v21, %v236_v19 }
  0xcc   : > { %v233_v25 = vadd.f32 %v232_v22, %v231_v20  ;;  %v239_v26 = vrot.slane %v238_v23, 1 }
  0xce   : > { %v240_v27 = vadd.f32 %v239_v26, %v238_v23  ;;  %v243_v28 = vadd.f32 %v242_v24, %v233_v25 }
  0xd0   : > { %v244_v29 = vadd.f32 %v242_v24, %v240_v27  ;;  %v374_v30 = vmul.f32 -1.442695, %v243_v28 }
  0xd2   : > { %448 = vpow2.f32 %v374_v30  ;;  %v375_v31 = vmul.f32 -1.442695, %v244_v29 }
  0xd4   : > { %450 = vpow2.f32 %v375_v31 }
  0xdc   : > { %v449_v32 = vpop.eup %448 }
  0xdd   : > { %v251_v33 = vadd.f32 1.0, %v449_v32 }
  0xde   : > { %v451_v34 = vpop.eup %450 }
  0xdf   : > { %v252_v35 = vadd.f32 1.0, %v451_v34  ;;  %452 = vrcp.f32 %v251_v33 }
  0xe1   : > { %454 = vrcp.f32 %v252_v35 }
  0xe9   : > { %v453_v36 = vpop.eup %452 }
  0xeb   : > { %v455_v37 = vpop.eup %454 }
  0xec   : > { %v259_v38 = vcombine.low %v453_v36, %v455_v37 }
  0xee   : > { %v261_v39 = vmul.f32 %v259_v38, %v208_v9 }
  0xf0   : > { %262 = vst [vmem:[%s205_s12] sm:$0xff] %v261_v39 }
  0xf1   : > { %499 = shalt.err (!%p496_p6)
}
  0xf2   : > { %s500_s4 = scalar_lea.hbm %s727_s22, 128  ;;  %s504_s8 = scalar_lea.hbm %s779_s3, 256 }
  0xf3   : > { %p501_p4 = scmp.ne.s32.totalorder %s727_s22, %s500_s4  ;;  %p505_p1 = scmp.lt.u32.totalorder %s727_s22, %s779_s3 }
  0xf4   : > { %p506_p2 = scmp.lt.u32.totalorder %s504_s8, %s500_s4  ;;  %p508_p8 = scmp.lt.u32.totalorder %s500_s4, %s727_s22 }
  0xf5   : > { %p502_p10 = pnand %p501_p4, %p788_p9 }
  0xf6   : > { %p507_p5 = por %p506_p2, %p505_p1 }
  0xf7   : > { %p503_p12 = pneg %p502_p10 }
  0xf8   : > { %p509_p11 = por %p508_p8, %p507_p5 }
  0xfa   : > { %p510_p0 = pnand %p509_p11, %p503_p12 }
  0xfc   : > { %513 = shalt.err (!%p510_p0)
}
  0xfd   : > { %385 = dma.vmem_to_hbm [thread:$0]  (%p788_p9), %s729_s13, 128, %s727_s22, %s264_s23  }
  0xfe PF: > { %s292_s9 = sand.u32 1, %s548_s14   ;;  %p789_p7 = scmp.ne.s32.totalorder %s784_s28, 0 }
  0xff   : > { %p790_p13 = scmp.ge.s32.totalorder %s568_s19, 2  ;;  %s293_s25 = scalar_lea.sflag [#allocation5], %s292_s9 }
 0x101   : > { %p392_p3 = pnand %p790_p13, %p789_p7 }
 0x103   : > { %543 = dma.done.wait (!%p392_p3), %s293_s25, 128  }
 0x104   : > { %545 = vsyncadd (!%p392_p3), %s293_s25, 4294967168  ;;  %s20_s19 = sadd.s32 1, %s568_s19   ;;  %s791_s14 = smov %s552_s15 }
 0x105   : > { %p17_p6 = scmp.ge.s32.totalorder %s20_s19, 4   ;;  %s792_s15 = smov %s556_s16 }
 0x106   : > { %s793_s16 = smov %s653_s27  ;;  %s794_s17 = smov %s564_s18 }
 0x107   : > { %s795_s18 = smov %s797_s21  ;;  %19 = sbr.rel (!%p17_p6) target bundleno = 8 (0x8), region = 77 }
 0x10e   :  { %298 = vsyncpa [#allocation4], 1 }
 0x10f   :  { %300 = vsyncpa [#allocation4 + $0x1], 1 }
 0x110   :  { %301 = vsyncpa [#allocation5], 1 }
 0x111   :  { %303 = vsyncpa [#allocation5 + $0x1], 1 }

</bundles_post_ra>
